<compile_context>
chip_gen: v5e
topology: v5e:2x2
jax: 0.10.0
libtpu: 0.0.40
codegen_flags: <defaults>
</compile_context>

<pallas_src>
import numpy as np
import jax
import jax.numpy as jnp
from jax.experimental import pallas as pl
from jax.experimental.pallas import tpu as pltpu

T_OBS = 10      # temporal_input  (obs_time)
T_PRED = 30     # temporal_output (pred_time)
FULL_DIM = 5    # feature dim of x
PB = 32         # per-coordinate row block padded 30 -> 32
SB = 2 * PB     # stacked [x-block | pad | y-block | pad] = 64
LANES = 128     # lane width (agents x scenes per grid step)

ROW_XY = 24                      # padded [ax; ay] rows (20 -> 24)
XROWS = ROW_XY + 12 * T_OBS + 3 * FULL_DIM * T_OBS + 2      # 24+120+150+2 = 296
WCOLS = 12 * T_OBS + 3 * FULL_DIM * T_OBS + 2               # 270 + 2       = 272
WROWS = 352
BROWS = 248
CROWS = 8 + LANES                                            # 136

# weight-slab row offsets
W_COND_LOC = 0      # rows   0: 48  (noise_cnn | locaclass embedding, block-diag)
W_FEAT_HWY = 48     # rows  48: 96  (feat k=3 | highway_input k=1)
W_SP = 96           # rows  96:160  (highway + tpcnn fused)
W_FUSE = 160        # rows 160:352  (cnn_fuse, 3 agent-tap blocks)
# bias-slab row offsets
B_COND_LOC = 0
B_FEAT_HWY = 48
B_SP = 96
B_FUSE = 160
B_WSCALE = 224      # learned scale `w`, replicated over 24 rows


# --------------------------------------------------------------------------- #
# Pallas kernel: whole FollowMeSTGCNN forward for one lane-group of scenes
# --------------------------------------------------------------------------- #
def _follow_me_kernel(x_ref, w_ref, b_ref, c_ref, out_ref):
  f32 = jnp.float32
  mm = lambda a, b: jnp.dot(a, b, preferred_element_type=f32)
  relu = lambda t: jnp.maximum(t, 0.0)
  L = out_ref.shape[1]

  bias = b_ref[...]                                    # (248, 1)
  axy = x_ref[0:ROW_XY, :]                             # (24, L)  [ax; ay; pad]
  xz = x_ref[ROW_XY:XROWS, :]                          # (272, L) [noise-op; feats; pad]

  # --- SocialCellLocal -------------------------------------------------------
  # noise_cnn condition + locaclass embedding: ONE block-diagonal matmul.
  y0 = relu(mm(w_ref[W_COND_LOC:48, :], xz) + bias[B_COND_LOC:48])   # (48, L)
  cond = y0[0:ROW_XY]                                  # (24, L)
  loc = y0[ROW_XY:48]                                  # (24, L)

  # v = x[..., :2] + w * condition
  pxy = axy + bias[B_WSCALE:BROWS] * cond              # (24, L)

  # feat (k=3 time conv) + highway_input (k=1): fused matmul, relu on top half.
  m = mm(w_ref[W_FEAT_HWY:96, 0:ROW_XY], pxy) + bias[B_FEAT_HWY:96]  # (48, L)
  gxy = relu(m[0:ROW_XY]) + m[ROW_XY:48]               # (24, L)

  # highway + tpcnn over the length-2 coord axis -> [spx | pad | spy | pad].
  sp = mm(w_ref[W_SP:160, 0:ROW_XY], gxy) + bias[B_SP:160]           # (64, L)

  # --- FusionAttentionCNN ----------------------------------------------------
  # cnn_fuse: one matmul over [sp ; loc] yields the three agent-tap blocks.
  v = mm(w_ref[W_FUSE:WROWS, 0:SB + ROW_XY],
         jnp.concatenate([sp, loc], axis=0))           # (192, L)

  # Neighbour taps along the agent (lane) axis: XLU rolls + per-scene boundary
  # masks (VPU) instead of shift matmuls.
  m_prev = c_ref[0:1, :]                               # 0 at first agent of a scene
  m_next = c_ref[1:2, :]                               # 0 at last agent of a scene
  f_pre = (bias[B_FUSE:224]
           + pltpu.roll(v[0:SB], shift=1, axis=1) * m_prev
           + v[SB:2 * SB]
           + pltpu.roll(v[2 * SB:3 * SB], shift=L - 1, axis=1) * m_next)
  fused = pl.reciprocal(1.0 + jnp.exp(-f_pre), approx=True)          # sigmoid (EUP)

  # attention: per-scene column = sp[:, lead] + sum_{others} fused * sp
  mix = fused * m_prev + (1.0 - m_prev)                # m_prev doubles as "others"
  out_ref[...] = mm(sp * mix, c_ref[8:8 + L, :])       # (64, L) lane-dense store


# --------------------------------------------------------------------------- #
# One-time parameter packing (model init), pure jnp -> two slabs
# --------------------------------------------------------------------------- #
def pack_params(p):
  T, P, F = T_OBS, T_PRED, FULL_DIM
  f32 = jnp.float32
  eyeT = lambda k: jnp.eye(T, k=k, dtype=f32)

  # noise_cnn (Conv2d 2T->T, 3x3 on a (2T,1,2) map): only the middle H-tap sees
  # data; fold (input-channel, width-tap) into one (2T, 12T) weight.
  kn = p["noise_w"].astype(f32)                                  # (T, 2T, 3, 3)
  wn = jnp.concatenate(
      [jnp.concatenate([kn[:, :T, 1, j], kn[:, T:, 1, j]], axis=1)
       for j in range(3)], axis=1)                               # (T, 6T)
  w_noise = jnp.einsum("tk,wv->wtkv", wn,
                       jnp.eye(2, dtype=f32)).reshape(2 * T, 12 * T)
  b_noise = jnp.tile(p["noise_b"].astype(f32), 2)                # (2T,)

  # cnn_locaclass_embedding (Conv2d F->2, 3x3): fold (feature, time-tap) per
  # agent-tap into one (2T, 3FT) weight matching the pre-shifted feature stack.
  kl = p["loc_w"].astype(f32)                                    # (2, F, 3, 3)
  bands = jnp.stack([eyeT(i - 1) for i in range(3)])             # (3, T, T)
  w_loc = jnp.einsum("efij,itu->etjfu", kl, bands).reshape(2 * T, 3 * F * T)
  b_loc = jnp.repeat(p["loc_b"].astype(f32), T)                  # (2T,)

  # feat (k=3 time conv, banded) + highway_input (k=1, block diag), fused.
  fw = p["feat_w"].astype(f32)                                   # (2, 2, 3)
  band = lambda o, c: (fw[o, c, 0] * eyeT(-1) + fw[o, c, 1] * eyeT(0)
                       + fw[o, c, 2] * eyeT(1))
  w_feat = jnp.concatenate(
      [jnp.concatenate([band(0, 0), band(0, 1)], axis=1),
       jnp.concatenate([band(1, 0), band(1, 1)], axis=1)], axis=0)   # (2T, 2T)
  b_feat = jnp.repeat(p["feat_b"].astype(f32), T)
  wh = p["hwyin_w"].astype(f32)[:, :, 0]                         # (2, 2)
  I = eyeT(0)
  w_hwy = jnp.concatenate(
      [jnp.concatenate([wh[0, 0] * I, wh[0, 1] * I], axis=1),
       jnp.concatenate([wh[1, 0] * I, wh[1, 1] * I], axis=1)], axis=0)
  b_hwy = jnp.repeat(p["hwyin_b"].astype(f32), T)

  # highway + tpcnn (length-2 coord axis, k=3 pad 1) -> padded [spx; spy].
  wc = p["hwy_w"].astype(f32)[:, :, 0] + p["tp_w"].astype(f32)[:, :, 1]
  wt0 = p["tp_w"].astype(f32)[:, :, 0]
  wt2 = p["tp_w"].astype(f32)[:, :, 2]
  bsp = (p["hwy_b"] + p["tp_b"]).astype(f32)                     # (P,)
  zrow = jnp.zeros((PB - P, 2 * T), f32)
  zb = jnp.zeros((PB - P,), f32)
  w_sp = jnp.concatenate([jnp.concatenate([wc, wt2], axis=1), zrow,
                          jnp.concatenate([wt0, wc], axis=1), zrow], axis=0)
  b_sp = jnp.concatenate([bsp, zb, bsp, zb])                     # (SB,)

  # cnn_fuse: rows = (agent-tap j, coord h) blocks of PB rows, columns aligned
  # with the padded sp stack and the loc embedding.
  kf = p["fuse_w"].astype(f32)                                   # (P, P+T, 3, 3)
  zcol = jnp.zeros((P, PB - P), f32)
  zsp = jnp.zeros((PB - P, SB), f32)
  zlc = jnp.zeros((PB - P, 2 * T), f32)
  rows_sp, rows_loc = [], []
  for j in range(3):
    for h in range(2):
      wfa = kf[:, :P, 1 - h, j]                                  # -> spx
      wfb = kf[:, :P, 2 - h, j]                                  # -> spy
      wfc = jnp.concatenate([kf[:, P:, 1 - h, j], kf[:, P:, 2 - h, j]], axis=1)
      rows_sp += [jnp.concatenate([wfa, zcol, wfb, zcol], axis=1), zsp]
      rows_loc += [wfc, zlc]
  w_fuse_sp = jnp.concatenate(rows_sp, axis=0)                   # (3*SB, SB)
  w_fuse_loc = jnp.concatenate(rows_loc, axis=0)                 # (3*SB, 2T)
  b_fuse = jnp.concatenate([p["fuse_b"].astype(f32), zb,
                            p["fuse_b"].astype(f32), zb])        # (SB,)

  # ---- assemble single weight slab and single bias slab
  W = jnp.zeros((WROWS, WCOLS), f32)
  W = W.at[0:2 * T, 0:12 * T].set(w_noise)
  W = W.at[ROW_XY:ROW_XY + 2 * T, 12 * T:12 * T + 3 * F * T].set(w_loc)
  W = W.at[W_FEAT_HWY:W_FEAT_HWY + 2 * T, 0:2 * T].set(w_feat)
  W = W.at[W_FEAT_HWY + ROW_XY:W_FEAT_HWY + ROW_XY + 2 * T, 0:2 * T].set(w_hwy)
  W = W.at[W_SP:W_SP + SB, 0:2 * T].set(w_sp)
  W = W.at[W_FUSE:WROWS, 0:SB].set(w_fuse_sp)
  W = W.at[W_FUSE:WROWS, SB:SB + 2 * T].set(w_fuse_loc)

  B = jnp.zeros((BROWS,), f32)
  B = B.at[0:2 * T].set(b_noise)
  B = B.at[ROW_XY:ROW_XY + 2 * T].set(b_loc)
  B = B.at[B_FEAT_HWY:B_FEAT_HWY + 2 * T].set(b_feat)
  B = B.at[B_FEAT_HWY + ROW_XY:B_FEAT_HWY + ROW_XY + 2 * T].set(b_hwy)
  B = B.at[B_SP:B_SP + SB].set(b_sp)
  B = B.at[B_FUSE:B_FUSE + SB].set(b_fuse)
  B = B.at[B_WSCALE:BROWS].set(jnp.broadcast_to(p["w"].astype(f32), (24,)))

  return {"wslab": W, "bslab": B.reshape(BROWS, 1)}


# --------------------------------------------------------------------------- #
# Per-call wrapper: lane-batching layout, layout constants, pallas_call (jitted)
# --------------------------------------------------------------------------- #
@jax.jit
def follow_me_stgcnn_forward(x, z, packed):
  """x: (S, T, N, F) scenes, z: (S, 2) noise samples -> (S, T_PRED, 2)."""
  S, T, N, F = x.shape
  assert T == T_OBS and F == FULL_DIM and 2 <= N <= LANES
  f32 = jnp.float32
  L = LANES
  G = L // N                       # scenes per lane-group (grid step)
  NG = -(-S // G)                  # grid steps
  S_pad = NG * G
  GN = G * N

  xp = jnp.pad(x.astype(f32), ((0, S_pad - S), (0, 0), (0, 0), (0, 0)))
  zp = jnp.pad(z.astype(f32), ((0, S_pad - S), (0, 0)))
  xg = xp.reshape(NG, G, T, N, F)
  zg = zp.reshape(NG, G, 2)

  # [ax ; ay] stacked observations, lane = scene-in-group * N + agent
  ax = jnp.transpose(xg[..., 0], (0, 2, 1, 3)).reshape(NG, T, GN)
  ay = jnp.transpose(xg[..., 1], (0, 2, 1, 3)).reshape(NG, T, GN)
  axy = jnp.concatenate([ax, ay, jnp.zeros((NG, ROW_XY - 2 * T, GN), f32)], axis=1)

  # noise_cnn operand: per-scene (lead, z) 12T-vector, replicated over the lanes
  lead = xg[:, :, :, 1, :2]                                    # (NG, G, T, 2)
  zrep = jnp.broadcast_to(zg[:, :, None, :], (NG, G, T, 2))
  lp = jnp.pad(lead, ((0, 0), (0, 0), (0, 0), (1, 1)))
  zpd = jnp.pad(zrep, ((0, 0), (0, 0), (0, 0), (1, 1)))
  nz = jnp.concatenate([lp[..., 0:2], zpd[..., 0:2], lp[..., 1:3], zpd[..., 1:3],
                        lp[..., 2:4], zpd[..., 2:4]], axis=2)   # (NG, G, 6T, 2)
  nz = nz.reshape(NG, G, 12 * T)
  nz = jnp.repeat(jnp.transpose(nz, (0, 2, 1)), N, axis=2)      # (NG, 12T, GN)

  # agent-pre-shifted feature stack for the locaclass 3x3 conv (per-scene pad)
  x5 = jnp.transpose(xg, (0, 1, 4, 2, 3)).reshape(NG, G, F * T, N)
  x5p = jnp.pad(x5, ((0, 0), (0, 0), (0, 0), (1, 1)))
  x5s = jnp.concatenate([x5p[..., 0:N], x5p[..., 1:N + 1], x5p[..., 2:N + 2]],
                        axis=2)                                  # (NG, G, 3FT, N)
  x5s = jnp.transpose(x5s, (0, 2, 1, 3)).reshape(NG, 3 * F * T, GN)

  xin = jnp.concatenate(
      [axy, nz, x5s,
       jnp.zeros((NG, XROWS - ROW_XY - 12 * T - 3 * F * T, GN), f32)], axis=1)
  xin = jnp.pad(xin, ((0, 0), (0, 0), (0, L - GN))).reshape(NG * XROWS, L)

  # shape-static per-scene lane layout constants (masks + scene selector)
  lane = np.arange(L)
  in_use = lane < GN
  m_prev = ((lane % N != 0) & in_use).astype(np.float32)
  m_next = ((lane % N != N - 1) & in_use).astype(np.float32)
  sel = (((lane[:, None] // N) == np.arange(L)[None, :]) & in_use[:, None])
  cslab = np.zeros((CROWS, L), np.float32)
  cslab[0] = m_prev
  cslab[1] = m_next
  cslab[8:8 + L] = sel.astype(np.float32)
  cslab = jnp.asarray(cslab)

  out = pl.pallas_call(
      _follow_me_kernel,
      out_shape=jax.ShapeDtypeStruct((NG * SB, L), jnp.float32),
      grid=(NG,),
      in_specs=[
          pl.BlockSpec((XROWS, L), lambda g: (g, 0)),        # per-group inputs
          pl.BlockSpec((WROWS, WCOLS), lambda g: (0, 0)),    # weights (resident)
          pl.BlockSpec((BROWS, 1), lambda g: (0, 0)),        # biases (resident)
          pl.BlockSpec((CROWS, L), lambda g: (0, 0)),        # lane layout consts
      ],
      out_specs=pl.BlockSpec((SB, L), lambda g: (g, 0)),
      compiler_params=pltpu.CompilerParams(dimension_semantics=("parallel",)),
  )(xin, packed["wslab"], packed["bslab"], cslab)

  res = out.reshape(NG, SB, L)[:, :, :G]                       # (NG, SB, G)
  res = jnp.transpose(res, (0, 2, 1)).reshape(S_pad, SB)[:S]   # (S, SB)
  return jnp.stack([res[:, 0:T_PRED], res[:, PB:PB + T_PRED]], axis=-1)


# --------------------------------------------------------------------------- #
# Pure-JAX reference (mechanical translation of the PyTorch module, batch 1)
# --------------------------------------------------------------------------- #
def _conv2d(x, w, b, pad):
  y = jax.lax.conv_general_dilated(
      x, w, window_strides=(1, 1), padding=((pad, pad), (pad, pad)),
      dimension_numbers=("NCHW", "OIHW", "NCHW"),
      precision=jax.lax.Precision.HIGHEST)
  return y + b.reshape(1, -1, 1, 1)


def _conv1d(x, w, b, pad):
  y = jax.lax.conv_general_dilated(
      x, w, window_strides=(1,), padding=((pad, pad),),
      dimension_numbers=("NCH", "OIH", "NCH"),
      precision=jax.lax.Precision.HIGHEST)
  return y + b.reshape(1, -1, 1)


def reference_forward(x, z, p):
  relu = jax.nn.relu
  # SocialCellLocal
  x_lead = x[:, :, 1:2, :2]
  noise = jnp.broadcast_to(z.reshape(1, 1, 1, 2), (1, x_lead.shape[1], 1, 2))
  cond = jnp.concatenate([x_lead, noise], axis=1)
  cond = relu(_conv2d(cond, p["noise_w"], p["noise_b"], 1))
  v = x[..., :2] + p["w"] * cond
  v = jnp.transpose(v, (0, 2, 3, 1))[0]                       # (N, 2, T)
  v_res = _conv1d(v, p["hwyin_w"], p["hwyin_b"], 0)
  v = relu(_conv1d(v, p["feat_w"], p["feat_b"], 1)) + v_res
  v = jnp.transpose(v, (0, 2, 1))                             # (N, T, 2)
  v_res = _conv1d(v, p["hwy_w"], p["hwy_b"], 0)
  v = _conv1d(v, p["tp_w"], p["tp_b"], 1) + v_res             # (N, P, 2)
  x_loc = jnp.transpose(v, (1, 0, 2))[None]                   # (1, P, N, 2)
  # FusionAttentionCNN
  vv = jnp.transpose(x, (0, 3, 1, 2))                         # (1, F, T, N)
  v_sp = jnp.transpose(x_loc, (0, 1, 3, 2))                   # (1, P, 2, N)
  v_loc = relu(_conv2d(vv, p["loc_w"], p["loc_b"], 1))
  v_loc = jnp.transpose(v_loc, (0, 2, 1, 3))                  # (1, T, 2, N)
  v_fused = jax.nn.sigmoid(
      _conv2d(jnp.concatenate([v_sp, v_loc], axis=1), p["fuse_w"], p["fuse_b"], 1))
  v_fused = v_fused[..., None, :][..., 1:]
  v_others = jnp.swapaxes(v_sp[..., None, :][..., 1:], -1, -2)
  v_contrib = jnp.matmul(v_fused, v_others,
                         precision=jax.lax.Precision.HIGHEST)[..., 0, 0]
  return v_sp[..., 0] + v_contrib                             # (1, P, 2)


# --------------------------------------------------------------------------- #
if __name__ == "__main__":
  key = jax.random.PRNGKey(0)
  keys = jax.random.split(key, 17)

  def init(k, shape, scale=0.1):
    return (scale * jax.random.normal(k, shape)).astype(jnp.float32)

  params = {
      "noise_w": init(keys[0], (T_OBS, 2 * T_OBS, 3, 3)),
      "noise_b": init(keys[1], (T_OBS,)),
      "feat_w": init(keys[2], (2, 2, 3)),
      "feat_b": init(keys[3], (2,)),
      "hwyin_w": init(keys[4], (2, 2, 1)),
      "hwyin_b": init(keys[5], (2,)),
      "hwy_w": init(keys[6], (T_PRED, T_OBS, 1)),
      "hwy_b": init(keys[7], (T_PRED,)),
      "tp_w": init(keys[8], (T_PRED, T_OBS, 3)),
      "tp_b": init(keys[9], (T_PRED,)),
      "w": init(keys[10], (1,), scale=1.0),
      "loc_w": init(keys[11], (2, FULL_DIM, 3, 3)),
      "loc_b": init(keys[12], (2,)),
      "fuse_w": init(keys[13], (T_PRED, T_PRED + T_OBS, 3, 3)),
      "fuse_b": init(keys[14], (T_PRED,)),
  }

  n_scenes, n_agents = 20, 8     # 20 scenes x 8 agents, 2 grid steps of 128 lanes
  x = jax.random.normal(keys[15], (n_scenes, T_OBS, n_agents, FULL_DIM),
                        jnp.float32)
  # One standard-normal 2-vector per scene (the module samples this internally).
  z = jax.random.normal(keys[16], (n_scenes, 2), jnp.float32)

  packed = pack_params(params)       # one-time "model init" packing (cached)
  out = follow_me_stgcnn_forward(x, z, packed)
  out = jax.block_until_ready(out)

  ref = jax.vmap(lambda xs, zs: reference_forward(xs[None], zs, params)[0])(x, z)
  np.testing.assert_allclose(np.asarray(out), np.asarray(ref),
                             rtol=2e-2, atol=2e-2)
  print("KERNEL_OK")
</pallas_src>

<mosaic_0001>
module attributes {stable_mosaic.version = 11 : i64} {
  func.func @_follow_me_kernel(%arg0: i32, %arg1: memref<296x128xf32, #tpu.memory_space<vmem>>, %arg2: memref<352x272xf32, #tpu.memory_space<vmem>>, %arg3: memref<248x1xf32, #tpu.memory_space<vmem>>, %arg4: memref<136x128xf32, #tpu.memory_space<vmem>>, %arg5: memref<64x128xf32, #tpu.memory_space<vmem>>) attributes {dimension_semantics = [#tpu.dimension_semantics<parallel>], iteration_bounds = array<i64: 2>, scalar_prefetch = 0 : i64, scratch_operands = 0 : i64, tpu.core_type = #tpu.core_type<tc>, window_params = [{transform_indices = @transform_0, window_bounds = array<i64: 296, 128>}, {pipeline_mode = #tpu.pipeline_mode<synchronous>, transform_indices = @transform_1, window_bounds = array<i64: 352, 272>}, {pipeline_mode = #tpu.pipeline_mode<synchronous>, transform_indices = @transform_2, window_bounds = array<i64: 248, 1>}, {pipeline_mode = #tpu.pipeline_mode<synchronous>, transform_indices = @transform_3, window_bounds = array<i64: 136, 128>}, {transform_indices = @transform_4, window_bounds = array<i64: 64, 128>}]} {
    %c0 = arith.constant 0 : index
    %c0_0 = arith.constant 0 : index
    %0 = vector.load %arg3[%c0, %c0_0] : memref<248x1xf32, #tpu.memory_space<vmem>>, vector<248x1xf32>
    %c0_1 = arith.constant 0 : index
    %c0_2 = arith.constant 0 : index
    %1 = vector.load %arg1[%c0_1, %c0_2] : memref<296x128xf32, #tpu.memory_space<vmem>>, vector<24x128xf32>
    %c24 = arith.constant 24 : index
    %c0_3 = arith.constant 0 : index
    %2 = vector.load %arg1[%c24, %c0_3] : memref<296x128xf32, #tpu.memory_space<vmem>>, vector<272x128xf32>
    %c0_4 = arith.constant 0 : index
    %c0_5 = arith.constant 0 : index
    %3 = vector.load %arg2[%c0_4, %c0_5] : memref<352x272xf32, #tpu.memory_space<vmem>>, vector<48x272xf32>
    %cst = arith.constant dense<0.000000e+00> : vector<48x128xf32>
    %4 = tpu.matmul %3, %2, %cst {dimension_numbers = #tpu.dot_dimension_numbers<[1], [0], [0], [1], [0, 0, 1, 1], [], []>} : vector<48x272xf32>, vector<272x128xf32>, vector<48x128xf32> -> vector<48x128xf32>
    %5 = vector.extract_strided_slice %0 {offsets = [0, 0], sizes = [48, 1], strides = [1, 1]} : vector<248x1xf32> to vector<48x1xf32>
    %6 = vector.broadcast %5 : vector<48x1xf32> to vector<48x128xf32>
    %7 = arith.addf %4, %6 : vector<48x128xf32>
    %cst_6 = arith.constant 0.000000e+00 : f32
    %8 = vector.broadcast %cst_6 : f32 to vector<48x128xf32>
    %9 = arith.maximumf %7, %8 : vector<48x128xf32>
    %10 = vector.extract_strided_slice %9 {offsets = [0, 0], sizes = [24, 128], strides = [1, 1]} : vector<48x128xf32> to vector<24x128xf32>
    %11 = vector.extract_strided_slice %9 {offsets = [24, 0], sizes = [24, 128], strides = [1, 1]} : vector<48x128xf32> to vector<24x128xf32>
    %12 = vector.extract_strided_slice %0 {offsets = [224, 0], sizes = [24, 1], strides = [1, 1]} : vector<248x1xf32> to vector<24x1xf32>
    %13 = vector.broadcast %12 : vector<24x1xf32> to vector<24x128xf32>
    %14 = arith.mulf %13, %10 : vector<24x128xf32>
    %15 = arith.addf %1, %14 : vector<24x128xf32>
    %c48 = arith.constant 48 : index
    %c0_7 = arith.constant 0 : index
    %16 = vector.load %arg2[%c48, %c0_7] : memref<352x272xf32, #tpu.memory_space<vmem>>, vector<48x24xf32>
    %cst_8 = arith.constant dense<0.000000e+00> : vector<48x128xf32>
    %17 = tpu.matmul %16, %15, %cst_8 {dimension_numbers = #tpu.dot_dimension_numbers<[1], [0], [0], [1], [0, 0, 1, 1], [], []>} : vector<48x24xf32>, vector<24x128xf32>, vector<48x128xf32> -> vector<48x128xf32>
    %18 = vector.extract_strided_slice %0 {offsets = [48, 0], sizes = [48, 1], strides = [1, 1]} : vector<248x1xf32> to vector<48x1xf32>
    %19 = vector.broadcast %18 : vector<48x1xf32> to vector<48x128xf32>
    %20 = arith.addf %17, %19 : vector<48x128xf32>
    %21 = vector.extract_strided_slice %20 {offsets = [0, 0], sizes = [24, 128], strides = [1, 1]} : vector<48x128xf32> to vector<24x128xf32>
    %cst_9 = arith.constant 0.000000e+00 : f32
    %22 = vector.broadcast %cst_9 : f32 to vector<24x128xf32>
    %23 = arith.maximumf %21, %22 : vector<24x128xf32>
    %24 = vector.extract_strided_slice %20 {offsets = [24, 0], sizes = [24, 128], strides = [1, 1]} : vector<48x128xf32> to vector<24x128xf32>
    %25 = arith.addf %23, %24 : vector<24x128xf32>
    %c96 = arith.constant 96 : index
    %c0_10 = arith.constant 0 : index
    %26 = vector.load %arg2[%c96, %c0_10] : memref<352x272xf32, #tpu.memory_space<vmem>>, vector<64x24xf32>
    %cst_11 = arith.constant dense<0.000000e+00> : vector<64x128xf32>
    %27 = tpu.matmul %26, %25, %cst_11 {dimension_numbers = #tpu.dot_dimension_numbers<[1], [0], [0], [1], [0, 0, 1, 1], [], []>} : vector<64x24xf32>, vector<24x128xf32>, vector<64x128xf32> -> vector<64x128xf32>
    %28 = vector.extract_strided_slice %0 {offsets = [96, 0], sizes = [64, 1], strides = [1, 1]} : vector<248x1xf32> to vector<64x1xf32>
    %29 = vector.broadcast %28 : vector<64x1xf32> to vector<64x128xf32>
    %30 = arith.addf %27, %29 : vector<64x128xf32>
    %c160 = arith.constant 160 : index
    %c0_12 = arith.constant 0 : index
    %31 = vector.load %arg2[%c160, %c0_12] : memref<352x272xf32, #tpu.memory_space<vmem>>, vector<192x88xf32>
    %32 = tpu.concatenate %30, %11 in 0 : vector<64x128xf32>, vector<24x128xf32> -> vector<88x128xf32>
    %cst_13 = arith.constant dense<0.000000e+00> : vector<192x128xf32>
    %33 = tpu.matmul %31, %32, %cst_13 {dimension_numbers = #tpu.dot_dimension_numbers<[1], [0], [0], [1], [0, 0, 1, 1], [], []>} : vector<192x88xf32>, vector<88x128xf32>, vector<192x128xf32> -> vector<192x128xf32>
    %c0_14 = arith.constant 0 : index
    %c0_15 = arith.constant 0 : index
    %34 = vector.load %arg4[%c0_14, %c0_15] : memref<136x128xf32, #tpu.memory_space<vmem>>, vector<1x128xf32>
    %c1 = arith.constant 1 : index
    %c0_16 = arith.constant 0 : index
    %35 = vector.load %arg4[%c1, %c0_16] : memref<136x128xf32, #tpu.memory_space<vmem>>, vector<1x128xf32>
    %36 = vector.extract_strided_slice %0 {offsets = [160, 0], sizes = [64, 1], strides = [1, 1]} : vector<248x1xf32> to vector<64x1xf32>
    %37 = vector.extract_strided_slice %33 {offsets = [0, 0], sizes = [64, 128], strides = [1, 1]} : vector<192x128xf32> to vector<64x128xf32>
    %c1_i32 = arith.constant 1 : i32
    %38 = tpu.dynamic_rotate %37 by %c1_i32 dim 1 : vector<64x128xf32>, i32 -> vector<64x128xf32>
    %39 = vector.broadcast %34 : vector<1x128xf32> to vector<64x128xf32>
    %40 = arith.mulf %38, %39 : vector<64x128xf32>
    %41 = vector.broadcast %36 : vector<64x1xf32> to vector<64x128xf32>
    %42 = arith.addf %41, %40 : vector<64x128xf32>
    %43 = vector.extract_strided_slice %33 {offsets = [64, 0], sizes = [64, 128], strides = [1, 1]} : vector<192x128xf32> to vector<64x128xf32>
    %44 = arith.addf %42, %43 : vector<64x128xf32>
    %45 = vector.extract_strided_slice %33 {offsets = [128, 0], sizes = [64, 128], strides = [1, 1]} : vector<192x128xf32> to vector<64x128xf32>
    %c127_i32 = arith.constant 127 : i32
    %46 = tpu.dynamic_rotate %45 by %c127_i32 dim 1 : vector<64x128xf32>, i32 -> vector<64x128xf32>
    %47 = vector.broadcast %35 : vector<1x128xf32> to vector<64x128xf32>
    %48 = arith.mulf %46, %47 : vector<64x128xf32>
    %49 = arith.addf %44, %48 : vector<64x128xf32>
    %cst_17 = arith.constant 0.000000e+00 : f32
    %50 = vector.broadcast %cst_17 : f32 to vector<64x128xf32>
    %51 = arith.subf %50, %49 : vector<64x128xf32>
    %52 = math.exp %51 : vector<64x128xf32>
    %cst_18 = arith.constant 1.000000e+00 : f32
    %53 = vector.broadcast %cst_18 : f32 to vector<64x128xf32>
    %54 = arith.addf %53, %52 : vector<64x128xf32>
    %55 = tpu.reciprocal %54 {approx = true} : vector<64x128xf32> -> vector<64x128xf32>
    %56 = vector.broadcast %34 : vector<1x128xf32> to vector<64x128xf32>
    %57 = arith.mulf %55, %56 : vector<64x128xf32>
    %cst_19 = arith.constant 1.000000e+00 : f32
    %58 = vector.broadcast %cst_19 : f32 to vector<1x128xf32>
    %59 = arith.subf %58, %34 : vector<1x128xf32>
    %60 = vector.broadcast %59 : vector<1x128xf32> to vector<64x128xf32>
    %61 = arith.addf %57, %60 : vector<64x128xf32>
    %62 = arith.mulf %30, %61 : vector<64x128xf32>
    %c8 = arith.constant 8 : index
    %c0_20 = arith.constant 0 : index
    %63 = vector.load %arg4[%c8, %c0_20] : memref<136x128xf32, #tpu.memory_space<vmem>>, vector<128x128xf32>
    %cst_21 = arith.constant dense<0.000000e+00> : vector<64x128xf32>
    %64 = tpu.matmul %62, %63, %cst_21 {dimension_numbers = #tpu.dot_dimension_numbers<[1], [0], [0], [1], [0, 0, 1, 1], [], []>} : vector<64x128xf32>, vector<128x128xf32>, vector<64x128xf32> -> vector<64x128xf32>
    %c0_22 = arith.constant 0 : index
    %c0_23 = arith.constant 0 : index
    %65 = vector.load %arg5[%c0_22, %c0_23] : memref<64x128xf32, #tpu.memory_space<vmem>>, vector<64x128xf32>
    tpu.vector_store %arg5[%c0_22, %c0_23], %64 {strides = array<i32>} : memref<64x128xf32, #tpu.memory_space<vmem>>, vector<64x128xf32>,
    return
  }
  func.func @transform_0(%arg0: i32) -> (i32, i32) {
    %c0_i32 = arith.constant 0 : i32
    %c0_i32_0 = arith.constant 0 : i32
    return %arg0, %c0_i32 : i32, i32
  }
  func.func @transform_1(%arg0: i32) -> (i32, i32) {
    %c0_i32 = arith.constant 0 : i32
    %c0_i32_0 = arith.constant 0 : i32
    %c0_i32_1 = arith.constant 0 : i32
    return %c0_i32, %c0_i32_0 : i32, i32
  }
  func.func @transform_2(%arg0: i32) -> (i32, i32) {
    %c0_i32 = arith.constant 0 : i32
    %c0_i32_0 = arith.constant 0 : i32
    %c0_i32_1 = arith.constant 0 : i32
    return %c0_i32, %c0_i32_0 : i32, i32
  }
  func.func @transform_3(%arg0: i32) -> (i32, i32) {
    %c0_i32 = arith.constant 0 : i32
    %c0_i32_0 = arith.constant 0 : i32
    %c0_i32_1 = arith.constant 0 : i32
    return %c0_i32, %c0_i32_0 : i32, i32
  }
  func.func @transform_4(%arg0: i32) -> (i32, i32) {
    %c0_i32 = arith.constant 0 : i32
    %c0_i32_0 = arith.constant 0 : i32
    return %arg0, %c0_i32 : i32, i32
  }
}

</mosaic_0001>

<bundles_post_ra>
// kernel: follow_me_stgcnn_forward.1
= control target key start
LH: loop header
LB: loop body
LE: loop exit
PB: predicated region body
PF: predicated region fallthrough
CT: control target
= control target key end

     0   :  { %s1326_s15 = smov 0   ;;  %s1855_s0 = inlined_call_operand.vmem [shape: f32[592,128], index: 0, kind: input, shape index: {}]   ;;  %s1856_s1 = inlined_call_operand.vmem [shape: f32[352,272], index: 1, kind: input, shape index: {}]   ;;  %s1857_s2 = inlined_call_operand.vmem [shape: f32[248,1], index: 2, kind: input, shape index: {}]   ;;  %s1858_s3 = inlined_call_operand.vmem [shape: f32[136,128], index: 3, kind: input, shape index: {}]   ;;  %s1859_s4 = inlined_call_operand.vmem [shape: f32[128,128], index: 4, kind: output, shape index: {}]  }
   0x1 LB: > { %s1166_s16 = sadd.s32 4294967295, %s1296_s15   ;;  %p1170_p0 = scmp.ge.s32.totalorder %s1296_s15, 1  ;;  %s1296_s15 = sphi %s1326_s15, %s14_s15  }
   0x2   : > { %p163_p1 = scmp.lt.s32.totalorder %s1296_s15, 3 }
   0x4   : > { %p164_p2 = pnand %p1170_p0, %p163_p1 }
   0x5   : > { %s189_s19 = smul.u32 (!%p164_p2), 37, %s1166_s16  ;;  %s1299_s5 = smov (!%p164_p2), 1  }
   0x6   : > { %167 = sbr.rel (%p164_p2) target bundleno = 1085 (0x43d), region = 36  ;;  %s1300_s6 = smov (!%p164_p2), 127  }
   0x7   : > { %p190_p3 = scmp.lt.s32.totalorder (!%p164_p2), %s189_s19, 73  ;;  %s1172_s23 = sshll.u32 (!%p164_p2), %s1166_s16, 3 }
   0x8   : > { %p196_p4 = scmp.lt.s32.totalorder (!%p164_p2), %s1172_s23, 15 }
   0xb   : > { %v203_v0 = vld [vmem:[%s1857_s2 + $0x10] sm:$0xff]  ;;  %v201_v1 = vld [vmem:[%s1857_s2] sm:$0xff]  ;;  %v1298_v2 = vmov 0   ;;  %s1861_s19 = smov (!%p190_p3, %s189_s19), 73  ;;  %v202_v3 = vld [vmem:[%s1857_s2 + $0x8] sm:$0xff]  ;;  %vm317_vm0 = vcmask 130048  }
   0xc   : > { %1253 = vset.pattern.permute.xlu0 %v1298_v2  ;;  %1254 = vset.pattern.permute.xlu1 %v1298_v2  ;;  %s1171_s22 = sshll.u32 %s1861_s19, 3  ;;  %v231_v4 = vld [vmem:[%s1857_s2 + $0xf0] sm:$0xff]  ;;  %v209_v15 = vld [vmem:[%s1857_s2 + $0x40] sm:$0xff]  ;;  %v208_v16 = vld [vmem:[%s1857_s2 + $0x38] sm:$0xff]  ;;  %vm504_vm1 = vcmask 195584   ;;  %vm701_vm2 = vcmask 719872  }
   0xd   : > { %299 = vperm.xlu0 %1253, %v203_v0   ;;  %289 = vperm.xlu1 %1254, %v201_v1   ;;  %s1345_s25 = scalar_lea.vmem %s1855_s0, %s1171_s22  ;;  %v230_v25 = vld [vmem:[%s1857_s2 + $0xe8] sm:$0xff]  ;;  %v271_v26 = vld [vmem:[%s1856_s1 + $0x10] sm:$0xff]  ;;  %v229_v35 = vld [vmem:[%s1857_s2 + $0xe0] sm:$0xff]  ;;  %s1863_s23 = smov (!%p196_p4, %s1172_s23), 15 }
   0xe   : > { %1255 = vset.pattern.permute.xlu2 %v1298_v2  ;;  %v250_v5 = vld [vmem:[%s1345_s25 + $0x90] sm:$0xff]  ;;  %v249_v6 = vld [vmem:[%s1345_s25 + $0x88] sm:$0xff]  ;;  %v248_v9 = vld [vmem:[%s1345_s25 + $0x80] sm:$0xff]  ;;  %s1173_s24 = sshll.u32 %s1863_s23, 3 }
   0xf   : > { %v266_v7 = vld [vmem:[%s1345_s25 + $0x110] sm:$0xff]  ;;  %336 = vmatpush.msra.mxu0 %v250_v5  ;;  %v265_v8 = vld [vmem:[%s1345_s25 + $0x108] sm:$0xff]  ;;  %v264_v10 = vld [vmem:[%s1345_s25 + $0x100] sm:$0xff]  ;;  %454 = vperm.xlu2 %1255, %v230_v25   ;;  %s199_s28 = scalar_lea.vmem %s1859_s4, %s1173_s24 }
  0x10   : > { %371 = vmatpush.msra.mxu1 %v266_v7  ;;  %v247_v11 = vld [vmem:[%s1345_s25 + $0x78] sm:$0xff]  ;;  %v246_v13 = vld [vmem:[%s1345_s25 + $0x70] sm:$0xff]  ;;  %v245_v17 = vld [vmem:[%s1345_s25 + $0x68] sm:$0xff] }
  0x11   : > { %337 = vmatpush.msra.mxu0 %v249_v6  ;;  %v263_v12 = vld [vmem:[%s1345_s25 + $0xf8] sm:$0xff]  ;;  %v262_v14 = vld [vmem:[%s1345_s25 + $0xf0] sm:$0xff]  ;;  %v261_v18 = vld [vmem:[%s1345_s25 + $0xe8] sm:$0xff] }
  0x12   : > { %372 = vmatpush.msra.mxu1 %v265_v8  ;;  %v268_v19 = vld [vmem:[%s1345_s25 + $0x120] sm:$0xff]  ;;  %v267_v22 = vld [vmem:[%s1345_s25 + $0x118] sm:$0xff]  ;;  %v242_v27 = vld [vmem:[%s1345_s25 + $0x50] sm:$0xff] }
  0x13   : > { %338 = vmatpush.msra.mxu0 %v248_v9  ;;  %v244_v20 = vld [vmem:[%s1345_s25 + $0x60] sm:$0xff]  ;;  %v243_v23 = vld [vmem:[%s1345_s25 + $0x58] sm:$0xff]  ;;  %420 = vmatpush.msra.mxu2 %v268_v19  ;;  %v258_v28 = vld [vmem:[%s1345_s25 + $0xd0] sm:$0xff] }
  0x14   : > { %373 = vmatpush.msra.mxu1 %v264_v10  ;;  %v260_v21 = vld [vmem:[%s1345_s25 + $0xe0] sm:$0xff]  ;;  %v259_v24 = vld [vmem:[%s1345_s25 + $0xd8] sm:$0xff]  ;;  %v207_v29 = vld [vmem:[%s1857_s2 + $0x30] sm:$0xff] }
  0x15   : > { %294 = vperm.xlu0 %1253, %v202_v3   ;;  %459 = vperm.xlu1 %1254, %v231_v4   ;;  %v211_v30 = vld [vmem:[%s1857_s2 + $0x50] sm:$0xff]  ;;  %v241_v31 = vld [vmem:[%s1345_s25 + $0x48] sm:$0xff]  ;;  %v240_v33 = vld [vmem:[%s1345_s25 + $0x40] sm:$0xff] }
  0x16   : > { %339 = vmatpush.msra.mxu0 %v247_v11  ;;  %374 = vmatpush.msra.mxu1 %v263_v12  ;;  %v257_v32 = vld [vmem:[%s1345_s25 + $0xc8] sm:$0xff]  ;;  %v256_v34 = vld [vmem:[%s1345_s25 + $0xc0] sm:$0xff]  ;;  %v239_v36 = vld [vmem:[%s1345_s25 + $0x38] sm:$0xff] }
  0x17   : > { %421 = vmatpush.msra.mxu2 %v267_v22  ;;  %v255_v37 = vld [vmem:[%s1345_s25 + $0xb8] sm:$0xff]  ;;  %v274_v38 = vld [vmem:[%s1856_s1 + $0x28] sm:$0xff]  ;;  %v238_v39 = vld [vmem:[%s1345_s25 + $0x30] sm:$0xff]  ;;  %449 = vperm.xlu2 %1255, %v229_v35  }
  0x18   : > { %340 = vmatpush.msra.mxu0 %v246_v13  ;;  %375 = vmatpush.msra.mxu1 %v262_v14  ;;  %v254_v40 = vld [vmem:[%s1345_s25 + $0xb0] sm:$0xff]  ;;  %v206_v41 = vld [vmem:[%s1857_s2 + $0x28] sm:$0xff]  ;;  %v205_v42 = vld [vmem:[%s1857_s2 + $0x20] sm:$0xff] }
  0x19   : > { %1174 = vmatmul.msk.f32.vlgmr.msra.gmra.mxu2 %vm317_vm0, %v271_v26  ;;  %v237_v43 = vld [vmem:[%s1345_s25 + $0x28] sm:$0xff]  ;;  %v236_v45 = vld [vmem:[%s1345_s25 + $0x20] sm:$0xff]  ;;  %v212_v47 = vld [vmem:[%s1857_s2 + $0x58] sm:$0xff] }
  0x1a   : > { %341 = vmatpush.msra.mxu0 %v245_v17  ;;  %376 = vmatpush.msra.mxu1 %v261_v18  ;;  %v253_v44 = vld [vmem:[%s1345_s25 + $0xa8] sm:$0xff]  ;;  %v252_v46 = vld [vmem:[%s1345_s25 + $0xa0] sm:$0xff]  ;;  %v235_v48 = vld [vmem:[%s1345_s25 + $0x18] sm:$0xff] }
  0x1b   : > { %v251_v49 = vld [vmem:[%s1345_s25 + $0x98] sm:$0xff]  ;;  %v269_v50 = vld [vmem:[%s1856_s1] sm:$0xff]  ;;  %v270_v51 = vld [vmem:[%s1856_s1 + $0x8] sm:$0xff] }
  0x1c   : > { %342 = vmatpush.msra.mxu0 %v244_v20  ;;  %377 = vmatpush.msra.mxu1 %v260_v21  ;;  %v277_v52 = vld [vmem:[%s1856_s1 + $0x40] sm:$0xff]  ;;  %v220_v53 = vld [vmem:[%s1857_s2 + $0x98] sm:$0xff]  ;;  %v219_v54 = vld [vmem:[%s1857_s2 + $0x90] sm:$0xff] }
  0x1d   : > { %486 = vperm.xlu0 %1253, %v209_v15   ;;  %481 = vperm.xlu1 %1254, %v208_v16   ;;  %v210_v55 = vld [vmem:[%s1857_s2 + $0x48] sm:$0xff]  ;;  %v272_v56 = vld [vmem:[%s1856_s1 + $0x18] sm:$0xff]  ;;  %v273_v57 = vld [vmem:[%s1856_s1 + $0x20] sm:$0xff] }
  0x1e   : > { %343 = vmatpush.msra.mxu0 %v243_v23  ;;  %378 = vmatpush.msra.mxu1 %v259_v24  ;;  %v280_v58 = vld [vmem:[%s1856_s1 + $0x58] sm:$0xff]  ;;  %v217_v59 = vld [vmem:[%s1857_s2 + $0x80] sm:$0xff]  ;;  %v275_v62 = vld [vmem:[%s1856_s1 + $0x30] sm:$0xff] }
  0x1f   : > { %501 = vperm.xlu2 %1255, %v212_v47   ;;  %v216_v60 = vld [vmem:[%s1857_s2 + $0x78] sm:$0xff]  ;;  %v283_v0 = vld [vmem:[%s1856_s1 + $0x70] sm:$0xff]  ;;  %v214_v1 = vld [vmem:[%s1857_s2 + $0x68] sm:$0xff] }
  0x20   : > { %344 = vmatpush.msra.mxu0 %v242_v27  ;;  %379 = vmatpush.msra.mxu1 %v258_v28  ;;  %v204_v61 = vld [vmem:[%s1857_s2 + $0x18] sm:$0xff]  ;;  %v213_v2 = vld [vmem:[%s1857_s2 + $0x60] sm:$0xff]  ;;  %v218_v3 = vld [vmem:[%s1857_s2 + $0x88] sm:$0xff] }
  0x21   : > { %1175 = vmatmul.msk.f32.gmra.mxu2 %vm317_vm0, %v274_v38  ;;  %v276_v63 = vld [vmem:[%s1856_s1 + $0x38] sm:$0xff]  ;;  %v278_v4 = vld [vmem:[%s1856_s1 + $0x48] sm:$0xff]  ;;  %v279_v5 = vld [vmem:[%s1856_s1 + $0x50] sm:$0xff] }
  0x22   : > { %345 = vmatpush.msra.mxu0 %v241_v31  ;;  %380 = vmatpush.msra.mxu1 %v257_v32  ;;  %v286_v6 = vld [vmem:[%s1856_s1 + $0x88] sm:$0xff]  ;;  %v221_v7 = vld [vmem:[%s1857_s2 + $0xa0] sm:$0xff]  ;;  %v215_v8 = vld [vmem:[%s1857_s2 + $0x70] sm:$0xff] }
  0x23   : > { %v281_v9 = vld [vmem:[%s1856_s1 + $0x60] sm:$0xff]  ;;  %v282_v10 = vld [vmem:[%s1856_s1 + $0x68] sm:$0xff]  ;;  %v284_v12 = vld [vmem:[%s1856_s1 + $0x78] sm:$0xff] }
  0x24   : > { %346 = vmatpush.msra.mxu0 %v240_v33  ;;  %381 = vmatpush.msra.mxu1 %v256_v34  ;;  %v222_v11 = vld [vmem:[%s1857_s2 + $0xa8] sm:$0xff]  ;;  %v285_v13 = vld [vmem:[%s1856_s1 + $0x80] sm:$0xff]  ;;  %v223_v14 = vld [vmem:[%s1857_s2 + $0xb0] sm:$0xff] }
  0x25   : > { %476 = vperm.xlu0 %1253, %v207_v29   ;;  %496 = vperm.xlu1 %1254, %v211_v30   ;;  %v224_v15 = vld [vmem:[%s1857_s2 + $0xb8] sm:$0xff]  ;;  %v225_v16 = vld [vmem:[%s1857_s2 + $0xc0] sm:$0xff]  ;;  %v226_v17 = vld [vmem:[%s1857_s2 + $0xc8] sm:$0xff] }
  0x26   : > { %347 = vmatpush.msra.mxu0 %v239_v36  ;;  %382 = vmatpush.msra.mxu1 %v255_v37  ;;  %v227_v18 = vld [vmem:[%s1857_s2 + $0xd0] sm:$0xff]  ;;  %v228_v19 = vld [vmem:[%s1857_s2 + $0xd8] sm:$0xff] }
  0x27   : > { %491 = vperm.xlu2 %1255, %v210_v55  }
  0x28   : > { %348 = vmatpush.msra.mxu0 %v238_v39  ;;  %383 = vmatpush.msra.mxu1 %v254_v40 }
  0x29   : > { %1176 = vmatmul.msk.f32.gmra.mxu2 %vm317_vm0, %v277_v52 }
  0x2a   : > { %349 = vmatpush.msra.mxu0 %v237_v43  ;;  %384 = vmatpush.msra.mxu1 %v253_v44 }
  0x2c   : > { %350 = vmatpush.msra.mxu0 %v236_v45  ;;  %385 = vmatpush.msra.mxu1 %v252_v46 }
  0x2d   : > { %314 = vperm.xlu0 %1253, %v206_v41   ;;  %309 = vperm.xlu1 %1254, %v205_v42  }
  0x2e   : > { %351 = vmatpush.msra.mxu0 %v235_v48  ;;  %386 = vmatpush.msra.mxu1 %v251_v49 }
  0x2f   : > { %352 = vmatmul.f32.vlgmr.msra.gmra.mxu0 %v269_v50  ;;  %387 = vmatmul.f32.vlgmr.msra.gmra.mxu1 %v270_v51 }
  0x30   : > { %304 = vperm.xlu2 %1255, %v204_v61   ;;  %v232_v61 = vld [vmem:[%s1345_s25] sm:$0xff] }
  0x31   : > { %1177 = vmatmul.msk.f32.gmra.mxu2 %vm317_vm0, %v280_v58 }
  0x35   : > { %609 = vperm.xlu0 %1253, %v220_v53   ;;  %604 = vperm.xlu1 %1254, %v219_v54   ;;  %v234_v53 = vld [vmem:[%s1345_s25 + $0x10] sm:$0xff] }
  0x37   : > { %355 = vmatmul.f32.gmra.mxu0 %v272_v56  ;;  %390 = vmatmul.f32.gmra.mxu1 %v273_v57  ;;  %v233_v57 = vld [vmem:[%s1345_s25 + $0x8] sm:$0xff] }
  0x38   : > { %599 = vperm.xlu2 %1255, %v218_v3  }
  0x39   : > { %1178 = vmatmul.msk.f32.gmra.mxu2 %vm317_vm0, %v283_v0 }
  0x3d   : > { %594 = vperm.xlu0 %1253, %v217_v59   ;;  %589 = vperm.xlu1 %1254, %v216_v60  }
  0x3f   : > { %358 = vmatmul.f32.gmra.mxu0 %v275_v62  ;;  %393 = vmatmul.f32.gmra.mxu1 %v276_v63 }
  0x40   : > { %584 = vperm.xlu2 %1255, %v215_v8  }
  0x41   : > { %1179 = vmatmul.msk.f32.gmra.mxu2 %vm317_vm0, %v286_v6 }
  0x45   : > { %579 = vperm.xlu0 %1253, %v214_v1   ;;  %574 = vperm.xlu1 %1254, %v213_v2   ;;  %v468_v1 = vld [vmem:[%s1856_s1 + $0x90] sm:$0xff] }
  0x47   : > { %361 = vmatmul.f32.gmra.mxu0 %v278_v4  ;;  %396 = vmatmul.f32.gmra.mxu1 %v279_v5 }
  0x4d   : > { %892 = vperm.xlu0 %1253, %v221_v7  }
  0x4f   : > { %364 = vmatmul.f32.gmra.mxu0 %v281_v9  ;;  %399 = vmatmul.f32.gmra.mxu1 %v282_v10  ;;  %v469_v10 = vld [vmem:[%s1856_s1 + $0xa8] sm:$0xff] }
  0x55   : > { %897 = vperm.xlu0 %1253, %v222_v11  }
  0x57   : > { %367 = vmatmul.f32.gmra.mxu0 %v284_v12  ;;  %402 = vmatmul.f32.gmra.mxu1 %v285_v13 }
  0x5d   : > { %902 = vperm.xlu0 %1253, %v223_v14  }
  0x65   : > { %907 = vperm.xlu0 %1253, %v224_v15  }
  0x69   : > { %v455_v23 = vpop.permute.xlu2 %454 }
  0x6d   : > { %912 = vperm.xlu0 %1253, %v225_v16  }
  0x71   : > { %v450_v29 = vpop.permute.xlu2 %449 }
  0x75   : > { %917 = vperm.xlu0 %1253, %v226_v17  }
  0x79   : > { %v1530_v42 = vpop.permute.xlu2 %501 }
  0x7d   : > { %922 = vperm.xlu0 %1253, %v227_v18  }
  0x7f   : > { %v290_v21 = vpop.permute.xlu1 %289  ;;  %v300_v22 = vpop.permute.xlu0 %299 }
  0x81   : > { %v492_v60 = vpop.permute.xlu2 %491 }
  0x85   : > { %927 = vperm.xlu0 %1253, %v228_v19  }
  0x87   : > { %v460_v27 = vpop.permute.xlu1 %459  ;;  %v295_v28 = vpop.permute.xlu0 %294 }
  0x8a   : > { %v305_v7 = vpop.permute.xlu2 %304 }
  0x8f   : > { %v1528_v36 = vpop.permute.xlu1 %481  ;;  %v1532_v43 = vpop.permute.xlu0 %486 }
  0x97   : > { %v497_v56 = vpop.permute.xlu1 %496  ;;  %v477_v62 = vpop.permute.xlu0 %476 }
  0x9c   : > { %v423_v20 = vpop.f32.mrf.mxu2 }
  0x9f   : > { %v310_v5 = vpop.permute.xlu1 %309  ;;  %v315_v8 = vpop.permute.xlu0 %314 }
  0xa4   : > { %v426_v26 = vpop.f32.mrf.mxu2 }
  0xac   : > { %v353_v24 = vpop.f32.mrf.mxu0  ;;  %v388_v25 = vpop.f32.mrf.mxu1 }
  0xad   : > { %v354_v33 = vadd.f32 %v353_v24, %v290_v21  ;;  %v429_v34 = vpop.f32.mrf.mxu2 }
  0xaf   : > { %v389_v37 = vadd.f32 %v388_v25, %v354_v33  ;;  %v471_v25 = vld [vmem:[%s1856_s1 + $0xd8] sm:$0xff] }
  0xb1   : > { %v424_v44 = vadd.f32 %v423_v20, %v389_v37 }
  0xb3   : > { %v441_v49 = vmax.f32 %v424_v44, 0.0 }
  0xb4   : > { %v356_v30 = vpop.f32.mrf.mxu0  ;;  %v391_v31 = vpop.f32.mrf.mxu1 }
  0xb5   : > { %v357_v32 = vadd.f32 %v356_v30, %v295_v28  ;;  %v432_v48 = vpop.f32.mrf.mxu2  ;;  %v462_v58 = vmul.f32 %v450_v29, %v441_v49  ;;  %v567_v49 = vld [vmem:[%s1856_s1 + $0x168] sm:$0xff] }
  0xb7   : > { %v392_v35 = vadd.f32 %v391_v31, %v357_v32  ;;  %v465_v0 = vadd.f32 %v462_v58, %v232_v61 }
  0xb9   : > { %v427_v40 = vadd.f32 %v426_v26, %v392_v35  ;;  %v472_v26 = vld [vmem:[%s1856_s1 + $0xf0] sm:$0xff] }
  0xbb   : > { %v442_v46 = vmax.f32 %v427_v40, 0.0 }
  0xbc   : > { %v359_v38 = vpop.f32.mrf.mxu0  ;;  %v394_v39 = vpop.f32.mrf.mxu1 }
  0xbd   : > { %v360_v41 = vadd.f32 %v359_v38, %v300_v22  ;;  %v463_v54 = vmul.f32 %v455_v23, %v442_v46  ;;  %v435_v2 = vpop.f32.mrf.mxu2  ;;  %v470_v22 = vld [vmem:[%s1856_s1 + $0xc0] sm:$0xff] }
  0xbf   : > { %v395_v45 = vadd.f32 %v394_v39, %v360_v41  ;;  %v466_v63 = vadd.f32 %v463_v54, %v233_v57 }
  0xc1   : > { %v430_v47 = vadd.f32 %v429_v34, %v395_v45 }
  0xc3   : > { %v443_v50 = vmax.f32 %v430_v47, 0.0 }
  0xc4   : > { %v362_v51 = vpop.f32.mrf.mxu0  ;;  %v397_v52 = vpop.f32.mrf.mxu1 }
  0xc5   : > { %v464_v55 = vmul.f32 %v460_v27, %v443_v50  ;;  %v363_v9 = vadd.f32 %v362_v51, %v305_v7  ;;  %v438_v15 = vpop.f32.mrf.mxu2  ;;  %v473_v27 = vld [vmem:[%s1856_s1 + $0x108] sm:$0xff]  ;;  %v568_v50 = vld [vmem:[%s1856_s1 + $0x180] sm:$0xff]  ;;  %v569_v51 = vld [vmem:[%s1856_s1 + $0x198] sm:$0xff] }
  0xc7   : > { %v467_v59 = vadd.f32 %v464_v55, %v234_v53  ;;  %v398_v16 = vadd.f32 %v397_v52, %v363_v9  ;;  %v570_v52 = vld [vmem:[%s1856_s1 + $0x1b0] sm:$0xff]  ;;  %v571_v53 = vld [vmem:[%s1856_s1 + $0x1c8] sm:$0xff] }
  0xc9   : > { %536 = vmatpush.msra.mxu3 %v467_v59  ;;  %v433_v20 = vadd.f32 %v432_v48, %v398_v16  ;;  %v678_v16 = vld [vmem:[%s1856_s1 + $0x1f8] sm:$0xff] }
  0xcb   : > { %537 = vmatpush.msra.mxu3 %v466_v63  ;;  %v444_v24 = vmax.f32 %v433_v20, 0.0  ;;  %v600_v63 = vpop.permute.xlu2 %599  ;;  %v680_v20 = vld [vmem:[%s1856_s1 + $0x228] sm:$0xff] }
  0xcc   : > { %v365_v3 = vpop.f32.mrf.mxu0  ;;  %v400_v4 = vpop.f32.mrf.mxu1 }
  0xcd   : > { %538 = vmatpush.msra.mxu3 %v465_v0  ;;  %v366_v6 = vadd.f32 %v365_v3, %v310_v5 }
  0xce   : > { %1180 = vmatmul.msk.f32.vlgmr.msra.gmra.mxu3 %vm504_vm1, %v468_v1 }
  0xcf   : > { %v401_v13 = vadd.f32 %v400_v4, %v366_v6 }
  0xd1   : > { %v436_v18 = vadd.f32 %v435_v2, %v401_v13 }
  0xd3   : > { %v445_v23 = vmax.f32 %v436_v18, 0.0  ;;  %v679_v18 = vld [vmem:[%s1856_s1 + $0x210] sm:$0xff] }
  0xd4   : > { %v368_v11 = vpop.f32.mrf.mxu0  ;;  %v403_v12 = vpop.f32.mrf.mxu1 }
  0xd5   : > { %v369_v14 = vadd.f32 %v368_v11, %v315_v8  ;;  %v585_v8 = vpop.permute.xlu2 %584 }
  0xd6   : > { %1181 = vmatmul.msk.f32.gmra.mxu3 %vm504_vm1, %v469_v10 }
  0xd7   : > { %v404_v17 = vadd.f32 %v403_v12, %v369_v14  ;;  %v677_v14 = vld [vmem:[%s1856_s1 + $0x1e0] sm:$0xff] }
  0xd9   : > { %v439_v19 = vadd.f32 %v438_v15, %v404_v17  ;;  %v689_v15 = vld [vmem:[%s1856_s1 + $0x300] sm:$0xff]  ;;  %v690_v17 = vld [vmem:[%s1856_s1 + $0x318] sm:$0xff] }
  0xdb   : > { %v446_v21 = vmax.f32 %v439_v19, 0.0  ;;  %v691_v19 = vld [vmem:[%s1856_s1 + $0x330] sm:$0xff] }
  0xdd   : > { %779 = vmatpush.msrb.mxu1 %v446_v21  ;;  %1221 = vmatpush.msrb.mxu3 %v446_v21 }
  0xde   : > { %1182 = vmatmul.msk.f32.gmra.mxu3 %vm504_vm1, %v470_v22  ;;  %v681_v22 = vld [vmem:[%s1856_s1 + $0x240] sm:$0xff] }
  0xdf   : > { %780 = vmatpush.msrb.mxu1 %v445_v23  ;;  %1223 = vmatpush.msrb.mxu3 %v445_v23 }
  0xe1   : > { %781 = vmatpush.msrb.mxu1 %v444_v24  ;;  %1225 = vmatpush.msrb.mxu3 %v444_v24 }
  0xe6   : > { %1183 = vmatmul.msk.f32.gmra.mxu3 %vm504_vm1, %v471_v25  ;;  %v694_v25 = vld [vmem:[%s1856_s1 + $0x378] sm:$0xff] }
  0xee   : > { %1184 = vmatmul.msk.f32.gmra.mxu3 %vm504_vm1, %v472_v26  ;;  %v683_v26 = vld [vmem:[%s1856_s1 + $0x270] sm:$0xff] }
  0xf6   : > { %1185 = vmatmul.msk.f32.gmra.mxu3 %vm504_vm1, %v473_v27  ;;  %v695_v27 = vld [vmem:[%s1856_s1 + $0x390] sm:$0xff] }
 0x151   : > { %v540_v28 = vpop.f32.mrf.mxu3 }
 0x152   : > { %v541_v37 = vadd.f32 %v540_v28, %v477_v62  ;;  %v605_v62 = vpop.permute.xlu1 %604  ;;  %v684_v28 = vld [vmem:[%s1856_s1 + $0x288] sm:$0xff] }
 0x154   : > { %v558_v46 = vmax.f32 %v541_v37, 0.0  ;;  %v699_v37 = vld [vmem:[%s1856_s1 + $0x3f0] sm:$0xff] }
 0x159   : > { %v543_v29 = vpop.f32.mrf.mxu3 }
 0x15a   : > { %v544_v34 = vadd.f32 %v543_v29, %v1528_v36  ;;  %v565_v36 = vld [vmem:[%s1856_s1 + $0x138] sm:$0xff]  ;;  %v590_v4 = vpop.permute.xlu1 %589  ;;  %v696_v29 = vld [vmem:[%s1856_s1 + $0x3a8] sm:$0xff] }
 0x15c   : > { %v559_v41 = vmax.f32 %v544_v34, 0.0  ;;  %v698_v34 = vld [vmem:[%s1856_s1 + $0x3d8] sm:$0xff] }
 0x161   : > { %v546_v30 = vpop.f32.mrf.mxu3 }
 0x162   : > { %v547_v33 = vadd.f32 %v546_v30, %v1532_v43  ;;  %v564_v43 = vld [vmem:[%s1856_s1 + $0x120] sm:$0xff]  ;;  %v575_v12 = vpop.permute.xlu1 %574  ;;  %v686_v30 = vld [vmem:[%s1856_s1 + $0x2b8] sm:$0xff] }
 0x164   : > { %v560_v38 = vmax.f32 %v547_v33, 0.0  ;;  %v687_v33 = vld [vmem:[%s1856_s1 + $0x2d0] sm:$0xff] }
 0x169   : > { %v549_v31 = vpop.f32.mrf.mxu3 }
 0x16a   : > { %v550_v44 = vadd.f32 %v549_v31, %v492_v60  ;;  %v610_v60 = vpop.permute.xlu0 %609  ;;  %v685_v31 = vld [vmem:[%s1856_s1 + $0x2a0] sm:$0xff] }
 0x16c   : > { %v561_v48 = vadd.f32 %v558_v46, %v550_v44 }
 0x171   : > { %v552_v32 = vpop.f32.mrf.mxu3 }
 0x172   : > { %v553_v39 = vadd.f32 %v552_v32, %v497_v56  ;;  %v595_v2 = vpop.permute.xlu0 %594  ;;  %v697_v32 = vld [vmem:[%s1856_s1 + $0x3c0] sm:$0xff] }
 0x174   : > { %v562_v47 = vadd.f32 %v559_v41, %v553_v39 }
 0x179   : > { %v555_v35 = vpop.f32.mrf.mxu3 }
 0x17a   : > { %v556_v40 = vadd.f32 %v555_v35, %v1530_v42  ;;  %v566_v42 = vld [vmem:[%s1856_s1 + $0x150] sm:$0xff]  ;;  %v580_v10 = vpop.permute.xlu0 %579  ;;  %v688_v35 = vld [vmem:[%s1856_s1 + $0x2e8] sm:$0xff] }
 0x17c   : > { %v563_v45 = vadd.f32 %v560_v38, %v556_v40  ;;  %v700_v38 = vld [vmem:[%s1856_s1 + $0x408] sm:$0xff] }
 0x17e   : > { %649 = vmatpush.msrb.mxu2 %v563_v45 }
 0x180   : > { %650 = vmatpush.msrb.mxu2 %v562_v47 }
 0x182   : > { %651 = vmatpush.msrb.mxu2 %v561_v48 }
 0x183   : > { %1186 = vmatmul.msk.f32.vlgmr.msrb.gmra.mxu2 %vm504_vm1, %v564_v43 }
 0x184   : > { %1220 = vmatpush.msra.mxu2 %v446_v21  ;;  %v692_v21 = vld [vmem:[%s1856_s1 + $0x348] sm:$0xff] }
 0x186   : > { %1222 = vmatpush.msra.mxu2 %v445_v23  ;;  %v693_v23 = vld [vmem:[%s1856_s1 + $0x360] sm:$0xff] }
 0x188   : > { %1224 = vmatpush.msra.mxu2 %v444_v24  ;;  %v682_v24 = vld [vmem:[%s1856_s1 + $0x258] sm:$0xff] }
 0x18b   : > { %1187 = vmatmul.msk.f32.gmra.mxu2 %vm504_vm1, %v565_v36 }
 0x193   : > { %1188 = vmatmul.msk.f32.gmra.mxu2 %vm504_vm1, %v566_v42 }
 0x19b   : > { %1189 = vmatmul.msk.f32.gmra.mxu2 %vm504_vm1, %v567_v49 }
 0x1a3   : > { %1190 = vmatmul.msk.f32.gmra.mxu2 %vm504_vm1, %v568_v50 }
 0x1ab   : > { %1191 = vmatmul.msk.f32.gmra.mxu2 %vm504_vm1, %v569_v51 }
 0x1b3   : > { %1192 = vmatmul.msk.f32.gmra.mxu2 %vm504_vm1, %v570_v52 }
 0x1bb   : > { %1193 = vmatmul.msk.f32.gmra.mxu2 %vm504_vm1, %v571_v53 }
 0x206   : > { %v653_v54 = vpop.f32.mrf.mxu2 }
 0x207   : > { %v1628_v13 = vadd.f32 %v653_v54, %v575_v12  ;;  %v1051_v12 = vld [vmem:[%s1858_s3 + $0x38] sm:$0xff] }
 0x20e   : > { %v656_v55 = vpop.f32.mrf.mxu2 }
 0x20f   : > { %v1623_v11 = vadd.f32 %v656_v55, %v580_v10  ;;  %v1052_v10 = vld [vmem:[%s1858_s3 + $0x40] sm:$0xff] }
 0x216   : > { %v659_v56 = vpop.f32.mrf.mxu2 }
 0x217   : > { %v1618_v9 = vadd.f32 %v659_v56, %v585_v8  ;;  %v893_v8 = vpop.permute.xlu0 %892 }
 0x21e   : > { %v662_v57 = vpop.f32.mrf.mxu2 }
 0x21f   : > { %v1613_v7 = vadd.f32 %v662_v57, %v590_v4  ;;  %v1053_v4 = vld [vmem:[%s1858_s3 + $0x48] sm:$0xff] }
 0x226   : > { %v665_v58 = vpop.f32.mrf.mxu2 }
 0x227   : > { %v1608_v6 = vadd.f32 %v665_v58, %v595_v2  ;;  %v1060_v58 = vld [vmem:[%s1858_s3 + $0x80] sm:$0xff]  ;;  %v1054_v2 = vld [vmem:[%s1858_s3 + $0x50] sm:$0xff] }
 0x228   : > { %1061 = vmatpush.msrb.mxu0 %v1060_v58 }
 0x22e   : > { %v668_v59 = vpop.f32.mrf.mxu2 }
 0x22f   : > { %v1603_v5 = vadd.f32 %v668_v59, %v600_v63  ;;  %v1059_v59 = vld [vmem:[%s1858_s3 + $0x78] sm:$0xff] }
 0x230   : > { %1062 = vmatpush.msrb.mxu0 %v1059_v59 }
 0x236   : > { %v671_v61 = vpop.f32.mrf.mxu2 }
 0x237   : > { %v1598_v3 = vadd.f32 %v671_v61, %v605_v62  ;;  %v1057_v61 = vld [vmem:[%s1858_s3 + $0x68] sm:$0xff]  ;;  %v1056_v62 = vld [vmem:[%s1858_s3 + $0x60] sm:$0xff] }
 0x23e   : > { %v674_v0 = vpop.f32.mrf.mxu2 }
 0x23f   : > { %v1596_v1 = vadd.f32 %v674_v0, %v610_v60  ;;  %v1058_v60 = vld [vmem:[%s1858_s3 + $0x70] sm:$0xff]  ;;  %v1055_v0 = vld [vmem:[%s1858_s3 + $0x58] sm:$0xff] }
 0x240   : > { %1063 = vmatpush.msrb.mxu0 %v1058_v60 }
 0x241   : > { %782 = vmatpush.msrb.mxu1 %v1596_v1  ;;  %1226 = vmatpush.msra.mxu2 %v1596_v1 }
 0x242   : > { %1227 = vmatpush.msrb.mxu3 %v1596_v1  ;;  %1064 = vmatpush.msrb.mxu0 %v1057_v61 }
 0x243   : > { %783 = vmatpush.msrb.mxu1 %v1598_v3  ;;  %1228 = vmatpush.msra.mxu2 %v1598_v3 }
 0x244   : > { %1229 = vmatpush.msrb.mxu3 %v1598_v3  ;;  %1065 = vmatpush.msrb.mxu0 %v1056_v62 }
 0x245   : > { %784 = vmatpush.msrb.mxu1 %v1603_v5  ;;  %1230 = vmatpush.msra.mxu2 %v1603_v5 }
 0x246   : > { %1231 = vmatpush.msrb.mxu3 %v1603_v5  ;;  %1066 = vmatpush.msrb.mxu0 %v1055_v0 }
 0x247   : > { %785 = vmatpush.msrb.mxu1 %v1608_v6  ;;  %1232 = vmatpush.msra.mxu2 %v1608_v6 }
 0x248   : > { %1233 = vmatpush.msrb.mxu3 %v1608_v6  ;;  %1067 = vmatpush.msrb.mxu0 %v1054_v2 }
 0x249   : > { %786 = vmatpush.msrb.mxu1 %v1613_v7  ;;  %1234 = vmatpush.msra.mxu2 %v1613_v7 }
 0x24a   : > { %1235 = vmatpush.msrb.mxu3 %v1613_v7  ;;  %1068 = vmatpush.msrb.mxu0 %v1053_v4 }
 0x24b   : > { %787 = vmatpush.msrb.mxu1 %v1618_v9  ;;  %1236 = vmatpush.msra.mxu2 %v1618_v9 }
 0x24c   : > { %1237 = vmatpush.msrb.mxu3 %v1618_v9  ;;  %1069 = vmatpush.msrb.mxu0 %v1052_v10 }
 0x24d   : > { %788 = vmatpush.msrb.mxu1 %v1623_v11  ;;  %1238 = vmatpush.msra.mxu2 %v1623_v11 }
 0x24e   : > { %1239 = vmatpush.msrb.mxu3 %v1623_v11  ;;  %1070 = vmatpush.msrb.mxu0 %v1051_v12 }
 0x24f   : > { %789 = vmatpush.msrb.mxu1 %v1628_v13  ;;  %1240 = vmatpush.msra.mxu2 %v1628_v13 }
 0x250   : > { %1241 = vmatpush.msrb.mxu3 %v1628_v13  ;;  %1194 = vmatmul.msk.f32.vlgmr.msrb.gmra.mxu1 %vm701_vm2, %v677_v14 }
 0x251   : > { %1206 = vmatmul.msk.f32.vlgmr.msrb.gmra.mxu3 %vm701_vm2, %v689_v15  ;;  %1203 = vmatmul.msk.f32.vlgmr.msra.gmra.mxu2 %vm701_vm2, %v686_v30  ;;  %v1050_v15 = vld [vmem:[%s1858_s3 + $0x30] sm:$0xff] }
 0x252   : > { %1071 = vmatpush.msrb.mxu0 %v1050_v15 }
 0x258   : > { %1195 = vmatmul.msk.f32.gmra.mxu1 %vm701_vm2, %v678_v16  ;;  %v1776_v16 = vld [vmem:[%s1858_s3] ss:$0 sm:$0xff] }
 0x259   : > { %1207 = vmatmul.msk.f32.gmra.mxu3 %vm701_vm2, %v690_v17  ;;  %1204 = vmatmul.msk.f32.gmra.mxu2 %vm701_vm2, %v687_v33  ;;  %v1049_v17 = vld [vmem:[%s1858_s3 + $0x28] sm:$0xff] }
 0x25a   : > { %1072 = vmatpush.msrb.mxu0 %v1049_v17 }
 0x260   : > { %1196 = vmatmul.msk.f32.gmra.mxu1 %vm701_vm2, %v679_v18  ;;  %v1048_v18 = vld [vmem:[%s1858_s3 + $0x20] sm:$0xff] }
 0x261   : > { %1208 = vmatmul.msk.f32.gmra.mxu3 %vm701_vm2, %v691_v19  ;;  %1205 = vmatmul.msk.f32.gmra.mxu2 %vm701_vm2, %v688_v35  ;;  %v898_v19 = vpop.permute.xlu0 %897 }
 0x262   : > { %1073 = vmatpush.msrb.mxu0 %v1048_v18 }
 0x268   : > { %1197 = vmatmul.msk.f32.gmra.mxu1 %vm701_vm2, %v680_v20 }
 0x269   : > { %1209 = vmatmul.msk.f32.gmra.mxu3 %vm701_vm2, %v692_v21  ;;  %v1047_v21 = vld [vmem:[%s1858_s3 + $0x18] sm:$0xff] }
 0x26a   : > { %1074 = vmatpush.msrb.mxu0 %v1047_v21 }
 0x270   : > { %1198 = vmatmul.msk.f32.gmra.mxu1 %vm701_vm2, %v681_v22  ;;  %v1046_v22 = vld [vmem:[%s1858_s3 + $0x10] sm:$0xff] }
 0x271   : > { %1210 = vmatmul.msk.f32.gmra.mxu3 %vm701_vm2, %v693_v23  ;;  %1075 = vmatpush.msrb.mxu0 %v1046_v22 }
 0x278   : > { %1199 = vmatmul.msk.f32.gmra.mxu1 %vm701_vm2, %v682_v24 }
 0x279   : > { %1211 = vmatmul.msk.f32.gmra.mxu3 %vm701_vm2, %v694_v25  ;;  %v1794_v25 = vld [vmem:[%s1858_s3 + $0x1] ss:$0 sm:$0xff] }
 0x280   : > { %1200 = vmatmul.msk.f32.gmra.mxu1 %vm701_vm2, %v683_v26  ;;  %v1045_v26 = vld [vmem:[%s1858_s3 + $0x8] sm:$0xff] }
 0x281   : > { %1212 = vmatmul.msk.f32.gmra.mxu3 %vm701_vm2, %v695_v27  ;;  %1076 = vmatpush.msrb.mxu0 %v1045_v26 }
 0x288   : > { %1201 = vmatmul.msk.f32.gmra.mxu1 %vm701_vm2, %v684_v28 }
 0x289   : > { %1213 = vmatmul.msk.f32.gmra.mxu3 %vm701_vm2, %v696_v29 }
 0x290   : > { %1202 = vmatmul.msk.f32.gmra.mxu1 %vm701_vm2, %v685_v31 }
 0x291   : > { %1214 = vmatmul.msk.f32.gmra.mxu3 %vm701_vm2, %v697_v32  ;;  %v903_v32 = vpop.permute.xlu0 %902 }
 0x299   : > { %1215 = vmatmul.msk.f32.gmra.mxu3 %vm701_vm2, %v698_v34 }
 0x2a1   : > { %1216 = vmatmul.msk.f32.gmra.mxu3 %vm701_vm2, %v699_v37 }
 0x2a9   : > { %1217 = vmatmul.msk.f32.gmra.mxu3 %vm701_vm2, %v700_v38 }
 0x2cd   : > { %v791_v39 = vpop.f32.mrf.mxu1 }
 0x2ce   : > { %865 = vrot.lane.b32.xlu2 %v791_v39, %s1299_s5 }
 0x2d4   : > { %v1732_v40 = vpop.f32.mrf.mxu3  ;;  %v818_v33 = vpop.f32.mrf.mxu2 }
 0x2d5   : > { %v794_v41 = vpop.f32.mrf.mxu1 }
 0x2d6   : > { %867 = vrot.lane.b32.xlu2 %v794_v41, %s1299_s5 }
 0x2dc   : > { %v1734_v44 = vpop.f32.mrf.mxu3 }
 0x2dd   : > { %v797_v45 = vpop.f32.mrf.mxu1 }
 0x2de   : > { %869 = vrot.lane.b32.xlu2 %v797_v45, %s1299_s5 }
 0x2e4   : > { %v1736_v46 = vpop.f32.mrf.mxu3 }
 0x2e5   : > { %v800_v47 = vpop.f32.mrf.mxu1 }
 0x2e6   : > { %871 = vrot.lane.b32.xlu2 %v800_v47, %s1299_s5 }
 0x2ec   : > { %v1738_v48 = vpop.f32.mrf.mxu3 }
 0x2ed   : > { %v803_v43 = vpop.f32.mrf.mxu1 }
 0x2ee   : > { %873 = vrot.lane.b32.xlu2 %v803_v43, %s1299_s5 }
 0x2f4   : > { %v839_v36 = vpop.f32.mrf.mxu3 }
 0x2f5   : > { %946 = vrot.lane.b32.xlu1 %v839_v36, %s1300_s6  ;;  %v806_v42 = vpop.f32.mrf.mxu1 }
 0x2f6   : > { %875 = vrot.lane.b32.xlu2 %v806_v42, %s1299_s5  ;;  %v908_v42 = vpop.permute.xlu0 %907 }
 0x2fc   : > { %v842_v49 = vpop.f32.mrf.mxu3 }
 0x2fd   : > { %948 = vrot.lane.b32.xlu1 %v842_v49, %s1300_s6  ;;  %v809_v50 = vpop.f32.mrf.mxu1  ;;  %v821_v49 = vpop.f32.mrf.mxu2 }
 0x2fe   : > { %877 = vrot.lane.b32.xlu2 %v809_v50, %s1299_s5  ;;  %v913_v2 = vpop.permute.xlu0 %912 }
 0x304   : > { %v845_v51 = vpop.f32.mrf.mxu3 }
 0x305   : > { %950 = vrot.lane.b32.xlu1 %v845_v51, %s1300_s6  ;;  %v812_v52 = vpop.f32.mrf.mxu1  ;;  %v824_v4 = vpop.f32.mrf.mxu2 }
 0x306   : > { %879 = vrot.lane.b32.xlu2 %v812_v52, %s1299_s5 }
 0x30c   : > { %v848_v53 = vpop.f32.mrf.mxu3 }
 0x30d   : > { %952 = vrot.lane.b32.xlu1 %v848_v53, %s1300_s6  ;;  %v815_v27 = vpop.f32.mrf.mxu1 }
 0x314   : > { %v851_v54 = vpop.f32.mrf.mxu3 }
 0x315   : > { %954 = vrot.lane.b32.xlu1 %v851_v54, %s1300_s6  ;;  %v863_v54 = vld [vmem:[%s1858_s3] sm:$0x1] }
 0x316   : > { %v1027_v62 = vsub.f32 1.0, %v863_v54 }
 0x318   : > { %v1808_v12 = vperm.slane %v1027_v62, 0 }
 0x31c   : > { %v854_v55 = vpop.f32.mrf.mxu3 }
 0x31d   : > { %956 = vrot.lane.b32.xlu1 %v854_v55, %s1300_s6 }
 0x324   : > { %v857_v56 = vpop.f32.mrf.mxu3 }
 0x325   : > { %958 = vrot.lane.b32.xlu1 %v857_v56, %s1300_s6 }
 0x328   : > { %v866_v63 = vpop.permute.xlu2 %865 }
 0x329   : > { %v882_v20 = vmul.f32 %v1776_v16, %v866_v63 }
 0x32b   : > { %v930_v24 = vadd.f32 %v893_v8, %v882_v20 }
 0x32c   : > { %v860_v57 = vpop.f32.mrf.mxu3 }
 0x32d   : > { %960 = vrot.lane.b32.xlu1 %v860_v57, %s1300_s6  ;;  %v938_v29 = vadd.f32 %v930_v24, %v815_v27 }
 0x330   : > { %v868_v14 = vpop.permute.xlu2 %867 }
 0x331   : > { %v883_v30 = vmul.f32 %v1776_v16, %v868_v14 }
 0x333   : > { %v931_v35 = vadd.f32 %v898_v19, %v883_v30 }
 0x335   : > { %v939_v45 = vadd.f32 %v931_v35, %v818_v33 }
 0x338   : > { %v870_v23 = vpop.permute.xlu2 %869 }
 0x339   : > { %v884_v47 = vmul.f32 %v1776_v16, %v870_v23 }
 0x33b   : > { %v932_v50 = vadd.f32 %v903_v32, %v884_v47  ;;  %v918_v32 = vpop.permute.xlu0 %917 }
 0x33d   : > { %v940_v58 = vadd.f32 %v932_v50, %v821_v49 }
 0x340   : > { %v872_v38 = vpop.permute.xlu2 %871 }
 0x341   : > { %v885_v59 = vmul.f32 %v1776_v16, %v872_v38 }
 0x343   : > { %v933_v63 = vadd.f32 %v908_v42, %v885_v59 }
 0x345   : > { %v941_v19 = vadd.f32 %v933_v63, %v824_v4 }
 0x348   : > { %v874_v55 = vpop.permute.xlu2 %873 }
 0x349   : > { %v886_v15 = vmul.f32 %v1776_v16, %v874_v55 }
 0x34b   : > { %v934_v26 = vadd.f32 %v913_v2, %v886_v15 }
 0x34d   : > { %v942_v35 = vadd.f32 %v934_v26, %v1732_v40 }
 0x350   : > { %v876_v22 = vpop.permute.xlu2 %875 }
 0x367   : > { %v947_v28 = vpop.permute.xlu1 %946 }
 0x368   : > { %v963_v31 = vmul.f32 %v1794_v25, %v947_v28 }
 0x36a   : > { %v971_v34 = vadd.f32 %v963_v31, %v938_v29 }
 0x36c   : > { %v979_v37 = vsub.f32 0.0, %v971_v34 }
 0x36e   : > { %v987_v39 = vmul.f32 1.442695, %v979_v37  ;;  %v887_v37 = vmul.f32 %v1776_v16, %v876_v22 }
 0x36f   : > { %v949_v41 = vpop.permute.xlu1 %948 }
 0x370   : > { %1258 = vpow2.f32 %v987_v39  ;;  %v964_v43 = vmul.f32 %v1794_v25, %v949_v41  ;;  %v935_v47 = vadd.f32 %v918_v32, %v887_v37 }
 0x372   : > { %v972_v36 = vadd.f32 %v964_v43, %v939_v45  ;;  %v878_v45 = vpop.permute.xlu2 %877 }
 0x373   : > { %v888_v50 = vmul.f32 %v1776_v16, %v878_v45 }
 0x374   : > { %v980_v51 = vsub.f32 0.0, %v972_v36 }
 0x376   : > { %v1259_v52 = vpop.eup %1258  ;;  %v989_v53 = vmul.f32 1.442695, %v980_v51 }
 0x377   : > { %v1003_v56 = vadd.f32 1.0, %v1259_v52  ;;  %v951_v57 = vpop.permute.xlu1 %950 }
 0x378   : > { %1260 = vpow2.f32 %v989_v53  ;;  %v965_v60 = vmul.f32 %v1794_v25, %v951_v57  ;;  %v943_v53 = vadd.f32 %v935_v47, %v1734_v44 }
 0x379   : > { %1262 = vrcp.f32 %v1003_v56  ;;  %v923_v56 = vpop.permute.xlu0 %922 }
 0x37a   : > { %v973_v61 = vadd.f32 %v965_v60, %v940_v58  ;;  %v936_v58 = vadd.f32 %v923_v56, %v888_v50 }
 0x37c   : > { %v981_v0 = vsub.f32 0.0, %v973_v61  ;;  %v880_v61 = vpop.permute.xlu2 %879  ;;  %v944_v4 = vadd.f32 %v936_v58, %v1736_v46 }
 0x37e   : > { %v1261_v8 = vpop.eup %1260  ;;  %v991_v10 = vmul.f32 1.442695, %v981_v0 }
 0x37f   : > { %v1263_v14 = vpop.eup %1262  ;;  %v1004_v17 = vadd.f32 1.0, %v1261_v8  ;;  %v953_v18 = vpop.permute.xlu1 %952  ;;  %v889_v8 = vmul.f32 %v1776_v16, %v880_v61 }
 0x380   : > { %1264 = vpow2.f32 %v991_v10  ;;  %v966_v20 = vmul.f32 %v1794_v25, %v953_v18  ;;  %v1019_v21 = vmul.f32 %v1263_v14, %v1776_v16 }
 0x381   : > { %1266 = vrcp.f32 %v1004_v17  ;;  %v928_v17 = vpop.permute.xlu0 %927 }
 0x382   : > { %v974_v23 = vadd.f32 %v966_v20, %v941_v19  ;;  %v1029_v24 = vadd.f32 %v1808_v12, %v1019_v21  ;;  %v937_v18 = vadd.f32 %v928_v17, %v889_v8 }
 0x384   : > { %v982_v27 = vsub.f32 0.0, %v974_v23  ;;  %v1037_v28 = vmul.f32 %v1029_v24, %v1628_v13  ;;  %v945_v26 = vadd.f32 %v937_v18, %v1738_v48 }
 0x386   : > { %v1265_v29 = vpop.eup %1264  ;;  %v993_v30 = vmul.f32 1.442695, %v982_v27  ;;  %1077 = vmatmul.f32.vlgmr.msrb.gmra.mxu0 %v1037_v28 }
 0x387   : > { %v1267_v31 = vpop.eup %1266  ;;  %v1005_v33 = vadd.f32 1.0, %v1265_v29  ;;  %v955_v34 = vpop.permute.xlu1 %954 }
 0x388   : > { %1268 = vpow2.f32 %v993_v30  ;;  %v967_v38 = vmul.f32 %v1794_v25, %v955_v34  ;;  %v1020_v39 = vmul.f32 %v1267_v31, %v1776_v16 }
 0x389   : > { %1270 = vrcp.f32 %v1005_v33 }
 0x38a   : > { %v975_v41 = vadd.f32 %v967_v38, %v942_v35  ;;  %v1030_v13 = vadd.f32 %v1808_v12, %v1020_v39 }
 0x38c   : > { %v983_v43 = vsub.f32 0.0, %v975_v41  ;;  %v1038_v36 = vmul.f32 %v1030_v13, %v1623_v11 }
 0x38e   : > { %v1269_v42 = vpop.eup %1268  ;;  %v995_v49 = vmul.f32 1.442695, %v983_v43  ;;  %1080 = vmatmul.f32.gmra.mxu0 %v1038_v36 }
 0x38f   : > { %v1271_v40 = vpop.eup %1270  ;;  %v1006_v51 = vadd.f32 1.0, %v1269_v42  ;;  %v957_v52 = vpop.permute.xlu1 %956 }
 0x390   : > { %1272 = vpow2.f32 %v995_v49  ;;  %v968_v54 = vmul.f32 %v1794_v25, %v957_v52  ;;  %v1021_v55 = vmul.f32 %v1271_v40, %v1776_v16 }
 0x391   : > { %1274 = vrcp.f32 %v1006_v51 }
 0x392   : > { %v976_v57 = vadd.f32 %v968_v54, %v943_v53  ;;  %v1031_v11 = vadd.f32 %v1808_v12, %v1021_v55 }
 0x394   : > { %v984_v59 = vsub.f32 0.0, %v976_v57  ;;  %v1039_v60 = vmul.f32 %v1031_v11, %v1618_v9 }
 0x396   : > { %v1273_v62 = vpop.eup %1272  ;;  %v997_v63 = vmul.f32 1.442695, %v984_v59  ;;  %1083 = vmatmul.f32.gmra.mxu0 %v1039_v60 }
 0x397   : > { %v1275_v0 = vpop.eup %1274  ;;  %v1007_v2 = vadd.f32 1.0, %v1273_v62  ;;  %v959_v44 = vpop.permute.xlu1 %958 }
 0x398   : > { %1276 = vpow2.f32 %v997_v63  ;;  %v969_v10 = vmul.f32 %v1794_v25, %v959_v44  ;;  %v1022_v14 = vmul.f32 %v1275_v0, %v1776_v16 }
 0x399   : > { %1278 = vrcp.f32 %v1007_v2 }
 0x39a   : > { %v977_v15 = vadd.f32 %v969_v10, %v944_v4  ;;  %v1032_v9 = vadd.f32 %v1808_v12, %v1022_v14 }
 0x39c   : > { %v985_v19 = vsub.f32 0.0, %v977_v15  ;;  %v1040_v20 = vmul.f32 %v1032_v9, %v1613_v7 }
 0x39e   : > { %v1277_v21 = vpop.eup %1276  ;;  %v999_v22 = vmul.f32 1.442695, %v985_v19  ;;  %1086 = vmatmul.f32.gmra.mxu0 %v1040_v20 }
 0x39f   : > { %v1279_v46 = vpop.eup %1278  ;;  %v1008_v23 = vadd.f32 1.0, %v1277_v21  ;;  %v961_v24 = vpop.permute.xlu1 %960 }
 0x3a0   : > { %1280 = vpow2.f32 %v999_v22  ;;  %v970_v27 = vmul.f32 %v1794_v25, %v961_v24  ;;  %v1023_v28 = vmul.f32 %v1279_v46, %v1776_v16 }
 0x3a1   : > { %1282 = vrcp.f32 %v1008_v23 }
 0x3a2   : > { %v978_v29 = vadd.f32 %v970_v27, %v945_v26  ;;  %v1033_v30 = vadd.f32 %v1808_v12, %v1023_v28 }
 0x3a4   : > { %v986_v31 = vsub.f32 0.0, %v978_v29  ;;  %v1041_v7 = vmul.f32 %v1033_v30, %v1608_v6 }
 0x3a6   : > { %v1281_v32 = vpop.eup %1280  ;;  %v1001_v33 = vmul.f32 1.442695, %v986_v31  ;;  %1089 = vmatmul.f32.gmra.mxu0 %v1041_v7 }
 0x3a7   : > { %v1283_v34 = vpop.eup %1282  ;;  %v1009_v35 = vadd.f32 1.0, %v1281_v32 }
 0x3a8   : > { %1284 = vpow2.f32 %v1001_v33  ;;  %v1024_v37 = vmul.f32 %v1283_v34, %v1776_v16 }
 0x3a9   : > { %1286 = vrcp.f32 %v1009_v35 }
 0x3aa   : > { %v1034_v48 = vadd.f32 %v1808_v12, %v1024_v37 }
 0x3ac   : > { %v1042_v25 = vmul.f32 %v1034_v48, %v1603_v5 }
 0x3ae   : > { %v1285_v38 = vpop.eup %1284  ;;  %1092 = vmatmul.f32.gmra.mxu0 %v1042_v25 }
 0x3af   : > { %v1287_v39 = vpop.eup %1286  ;;  %v1010_v41 = vadd.f32 1.0, %v1285_v38 }
 0x3b0   : > { %v1025_v6 = vmul.f32 %v1287_v39, %v1776_v16 }
 0x3b1   : > { %1288 = vrcp.f32 %v1010_v41 }
 0x3b2   : > { %v1035_v13 = vadd.f32 %v1808_v12, %v1025_v6 }
 0x3b4   : > { %v1043_v45 = vmul.f32 %v1035_v13, %v1598_v3 }
 0x3b6   : > { %1095 = vmatmul.f32.gmra.mxu0 %v1043_v45 }
 0x3b7   : > { %v1289_v47 = vpop.eup %1288 }
 0x3b8   : > { %v1026_v43 = vmul.f32 %v1289_v47, %v1776_v16 }
 0x3ba   : > { %v1036_v36 = vadd.f32 %v1808_v12, %v1026_v43 }
 0x3bc   : > { %v1044_v42 = vmul.f32 %v1036_v36, %v1596_v1 }
 0x3be   : > { %1098 = vmatmul.f32.gmra.mxu0 %v1044_v42 }
 0x403   : > { %v1078_v5 = vpop.f32.mrf.mxu0 }
 0x404   : > { %1102 = vst [vmem:[%s199_s28] sm:$0xff] %v1078_v5 }
 0x40b   : > { %v1081_v3 = vpop.f32.mrf.mxu0 }
 0x40c   : > { %1103 = vst [vmem:[%s199_s28 + $0x8] sm:$0xff] %v1081_v3 }
 0x413   : > { %v1084_v49 = vpop.f32.mrf.mxu0 }
 0x414   : > { %1104 = vst [vmem:[%s199_s28 + $0x10] sm:$0xff] %v1084_v49 }
 0x41b   : > { %v1087_v16 = vpop.f32.mrf.mxu0 }
 0x41c   : > { %1105 = vst [vmem:[%s199_s28 + $0x18] sm:$0xff] %v1087_v16 }
 0x423   : > { %v1090_v12 = vpop.f32.mrf.mxu0 }
 0x424   : > { %1106 = vst [vmem:[%s199_s28 + $0x20] sm:$0xff] %v1090_v12 }
 0x42b   : > { %v1093_v1 = vpop.f32.mrf.mxu0 }
 0x42c   : > { %1107 = vst [vmem:[%s199_s28 + $0x28] sm:$0xff] %v1093_v1 }
 0x433   : > { %v1096_v40 = vpop.f32.mrf.mxu0 }
 0x434   : > { %1108 = vst [vmem:[%s199_s28 + $0x30] sm:$0xff] %v1096_v40 }
 0x43b   : > { %v1099_v50 = vpop.f32.mrf.mxu0 }
 0x43c   : > { %1109 = vst [vmem:[%s199_s28 + $0x38] sm:$0xff] %v1099_v50 }
 0x43d PF: > { %s14_s15 = sadd.s32 1, %s1296_s15  }
 0x43e   : > { %p11_p5 = scmp.ge.s32.totalorder %s14_s15, 4  }
 0x440   :  { %13 = sbr.rel (!%p11_p5) target bundleno = 1 (0x1), region = 66 }

</bundles_post_ra>
